<compile_context>
chip_gen: v7x
topology: tpu7x:2x2x1
jax: 0.10.0
libtpu: 0.0.40
codegen_flags: <defaults>
</compile_context>

<pallas_src>
import jax
import jax.numpy as jnp
import numpy as np
from jax.experimental import pallas as pl
from jax.experimental.pallas import tpu as pltpu


def _round_up(v, m):
    return ((v + m - 1) // m) * m


# ----------------------------------------------------------------------------- kernel
def _make_decoder_kernel(head_slices, compute_dtype):
    """Kernel closed over static head (offset, size) pairs and the MXU input dtype."""

    def kernel(x_ref, wfc_ref, bfc_ref, wh_ref, bh_ref, seg_ref, segt_ref, o_ref):
        # fc + ReLU: MXU matmul with f32 accumulation, elementwise in f32 on the VPU.
        h = jnp.dot(x_ref[...], wfc_ref[...],
                    preferred_element_type=jnp.float32) + bfc_ref[...]
        h = jnp.maximum(h, 0.0)

        # Single fused head matmul over all attributes: [TM, hidden] @ [hidden, P].
        logits = jnp.dot(h.astype(compute_dtype), wh_ref[...],
                         preferred_element_type=jnp.float32) + bh_ref[...]

        # Per-head maxes are tiny [TM, 1] lane-slice reductions; everything else is
        # slab-wide.  seg is a static one-hot segment matrix [P, n_heads] (pad lanes are
        # all-zero rows, so padding never enters any reduction).
        max_small = jnp.concatenate(
            [jnp.max(logits[:, off:off + s], axis=-1, keepdims=True)
             for off, s in head_slices], axis=-1)                     # [TM, n_heads]
        max_slab = jnp.dot(max_small, segt_ref[...],
                           preferred_element_type=jnp.float32)        # [TM, P]
        p = jnp.exp(logits - max_slab)                                # EUP, slab-wide
        sums = jnp.dot(p, seg_ref[...],
                       preferred_element_type=jnp.float32)            # [TM, n_heads]
        lse_small = max_small + jnp.log(sums)
        lse_slab = jnp.dot(lse_small, segt_ref[...],
                           preferred_element_type=jnp.float32)        # [TM, P]

        # One full-width, unmasked lane-dense store (pad lanes come out as exact zeros).
        o_ref[...] = (logits - lse_slab).astype(o_ref.dtype)

    return kernel


# --------------------------------------------------------------------- param packing
def pack_params(params, compute_dtype=jnp.bfloat16):
    """One-time packing of PyTorch-layout parameters (hoisted out of the call path)."""
    wfc_t = jnp.asarray(params["fc_w"]).T.astype(compute_dtype)       # [latent, hidden]
    bfc = jnp.asarray(params["fc_b"]).reshape(1, -1).astype(jnp.float32)

    sizes = tuple(int(w.shape[0]) for (w, _) in params["heads"])
    total = sum(sizes)
    P = _round_up(total, 128)                                         # lane-dense width

    w_cat = jnp.concatenate([jnp.asarray(w).T for (w, _) in params["heads"]], axis=1)
    b_cat = jnp.concatenate([jnp.asarray(b).reshape(1, -1) for (_, b) in params["heads"]],
                            axis=1)
    pad = P - total
    if pad:
        w_cat = jnp.pad(w_cat, ((0, 0), (0, pad)))
        b_cat = jnp.pad(b_cat, ((0, 0), (0, pad)))

    offsets = np.cumsum((0,) + sizes[:-1]).tolist()
    head_slices = tuple(zip(offsets, sizes))
    n_heads = len(sizes)

    # One-hot segment matrix: lane j belongs to head h.  Pad lanes are all-zero rows.
    seg_np = np.zeros((P, n_heads), np.float32)
    for hidx, (off, s) in enumerate(head_slices):
        seg_np[off:off + s, hidx] = 1.0

    return {
        "wfc_t": wfc_t,
        "bfc": bfc,
        "w_heads": w_cat.astype(compute_dtype),                       # [hidden, P]
        "b_heads": b_cat.astype(jnp.float32),                         # [1, P]
        "seg": jnp.asarray(seg_np),                                   # [P, n_heads]
        "seg_t": jnp.asarray(seg_np.T),                               # [n_heads, P]
        "head_slices": head_slices,
        "sizes": sizes,
        "P": P,
        "compute_dtype": compute_dtype,
    }


# -------------------------------------------------------------------------- forward
def attribute_decoder_forward(x, packed, tm_target=1024, out_dtype=jnp.float32):
    """Fused AttributeDecoder forward.  x: [B, latent] -> list of [B, s_i] log-probs."""
    B, latent = x.shape
    hidden = packed["wfc_t"].shape[1]
    P = packed["P"]
    n_heads = len(packed["sizes"])
    compute_dtype = packed["compute_dtype"]
    head_slices = packed["head_slices"]

    # Batch tile: big tiles (memory-bound), multiple of 16, and >= 2 grid steps for mid
    # batches so both v7x TensorCores get work.  No wrapper-side padding: Pallas masks
    # the boundary block (garbage rows are row-independent and never written back).
    if B >= 2 * tm_target:
        TM = tm_target
    else:
        TM = min(tm_target, max(16, _round_up(int(pl.cdiv(B, 2)), 16)))
    TM = min(TM, _round_up(B, 8))
    grid = int(pl.cdiv(B, TM))

    xp = x.astype(compute_dtype)
    kernel = _make_decoder_kernel(head_slices, compute_dtype)

    # Explicit VMEM budget (cap well under v7x's 64 MiB so double-buffering survives).
    isz = jnp.dtype(compute_dtype).itemsize
    osz = jnp.dtype(out_dtype).itemsize
    vmem_est = (2 * TM * latent * isz + 2 * TM * P * osz              # double-buffered tiles
                + latent * hidden * isz + hidden * 4                  # resident fc params
                + hidden * P * isz + P * 4                            # resident head slab
                + 2 * P * n_heads * 4                                 # seg / seg_t
                + TM * hidden * (4 + isz)                             # h (+ bf16 copy)
                + 3 * TM * P * 4 + 3 * TM * n_heads * 4)              # slab temporaries
    vmem_limit = int(min(max(2 * vmem_est, 8 * 2**20), 40 * 2**20))
    # TODO(synk): for very large hidden*P head slabs (v7x 64 MiB VMEM), add a second
    # "parallel" grid axis tiling P at head boundaries so the head weights stream.

    cost = pl.CostEstimate(
        flops=2 * B * (latent * hidden + hidden * P) + 4 * B * P * n_heads,
        transcendentals=B * (P + n_heads),
        bytes_accessed=(B * latent * isz + latent * hidden * isz + hidden * P * isz
                        + (hidden + P) * 4 + 2 * P * n_heads * 4 + B * P * osz))

    out = pl.pallas_call(
        kernel,
        out_shape=jax.ShapeDtypeStruct((B, P), out_dtype),
        grid=(grid,),
        in_specs=[
            pl.BlockSpec((TM, latent), lambda i: (i, 0)),       # x: tiled over batch
            pl.BlockSpec((latent, hidden), lambda i: (0, 0)),   # fc weight: VMEM-resident
            pl.BlockSpec((1, hidden), lambda i: (0, 0)),        # fc bias
            pl.BlockSpec((hidden, P), lambda i: (0, 0)),        # fused head weights
            pl.BlockSpec((1, P), lambda i: (0, 0)),             # fused head biases
            pl.BlockSpec((P, n_heads), lambda i: (0, 0)),       # one-hot segment matrix
            pl.BlockSpec((n_heads, P), lambda i: (0, 0)),       # its transpose
        ],
        out_specs=pl.BlockSpec((TM, P), lambda i: (i, 0)),      # lane-dense fused output
        compiler_params=pltpu.CompilerParams(
            dimension_semantics=("parallel",),                  # 2-TC sharding on v7x
            vmem_limit_bytes=vmem_limit),
        cost_estimate=cost,
    )(xp, packed["wfc_t"], packed["bfc"], packed["w_heads"], packed["b_heads"],
      packed["seg"], packed["seg_t"])

    # Split the fused slab back into per-head log-prob arrays (drops lane padding).
    return [out[:, off:off + s] for (off, s) in head_slices]


# ----------------------------------------------------------------- reference & init
def _init_params(key, label_embed_sizes, hidden_size, latent_size):
    """Deterministic synthetic parameter init (matches nn.Linear shapes)."""
    keys = jax.random.split(key, 2 + 2 * len(label_embed_sizes))
    params = {
        "fc_w": jax.random.normal(keys[0], (hidden_size, latent_size), jnp.float32) * 0.1,
        "fc_b": jax.random.normal(keys[1], (hidden_size,), jnp.float32) * 0.1,
        "heads": [],
    }
    for i, s in enumerate(label_embed_sizes):
        w = jax.random.normal(keys[2 + 2 * i], (s, hidden_size), jnp.float32) * 0.1
        b = jax.random.normal(keys[3 + 2 * i], (s,), jnp.float32) * 0.1
        params["heads"].append((w, b))
    return params


def _reference_forward(x, params):
    """Pure-JAX reference matching the PyTorch module semantics."""
    h = jax.nn.relu(x @ params["fc_w"].T + params["fc_b"])
    outs = []
    for (w, b) in params["heads"]:
        logits = h @ w.T + b
        outs.append(jax.nn.log_softmax(logits, axis=-1))
    return outs


if __name__ == "__main__":
    latent_size = 16
    hidden_size = 32
    label_embed_sizes = [6, 10, 4]

    key = jax.random.PRNGKey(0)
    k_x, k_p, k_x2 = jax.random.split(key, 3)
    params = _init_params(k_p, label_embed_sizes, hidden_size, latent_size)

    # Two batch sizes: tiny single-block, and one that exercises a multi-step grid with a
    # masked boundary block (no wrapper-side padding).
    for batch, kx in ((8, k_x), (50, k_x2)):
        x = jax.random.normal(kx, (batch, latent_size), jnp.float32)
        refs = _reference_forward(x, params)

        # --- f32 MXU path + f32 output: tight tolerance against the pure-JAX reference.
        packed_f32 = pack_params(params, compute_dtype=jnp.float32)
        log_probs = attribute_decoder_forward(x, packed_f32, out_dtype=jnp.float32)
        log_probs = [jax.block_until_ready(lp) for lp in log_probs]
        for lp, ref, s in zip(log_probs, refs, label_embed_sizes):
            assert lp.shape == (batch, s), (lp.shape, (batch, s))
            np.testing.assert_allclose(np.asarray(lp), np.asarray(ref),
                                       rtol=1e-5, atol=1e-5)

        # --- default fast path: bf16 MXU inputs + bf16 output, f32 accumulation/math.
        packed_bf16 = pack_params(params)                      # compute_dtype=bf16
        log_probs_bf16 = attribute_decoder_forward(x, packed_bf16, out_dtype=jnp.bfloat16)
        log_probs_bf16 = [jax.block_until_ready(lp) for lp in log_probs_bf16]
        for lp, ref in zip(log_probs_bf16, refs):
            np.testing.assert_allclose(np.asarray(lp).astype(np.float32),
                                       np.asarray(ref), rtol=5e-2, atol=5e-2)

    print("KERNEL_OK")
</pallas_src>

<mosaic_0001>
module attributes {stable_mosaic.version = 11 : i64} {
  func.func @kernel(%arg0: i32, %arg1: memref<8x16xf32, #tpu.memory_space<vmem>>, %arg2: memref<16x32xf32, #tpu.memory_space<vmem>>, %arg3: memref<1x32xf32, #tpu.memory_space<vmem>>, %arg4: memref<32x128xf32, #tpu.memory_space<vmem>>, %arg5: memref<1x128xf32, #tpu.memory_space<vmem>>, %arg6: memref<128x3xf32, #tpu.memory_space<vmem>>, %arg7: memref<3x128xf32, #tpu.memory_space<vmem>>, %arg8: memref<8x128xf32, #tpu.memory_space<vmem>>) attributes {dimension_semantics = [#tpu.dimension_semantics<parallel>], iteration_bounds = array<i64: 1>, scalar_prefetch = 0 : i64, scratch_operands = 0 : i64, tpu.core_type = #tpu.core_type<tc>, window_params = [{transform_indices = @transform_0, window_bounds = array<i64: 8, 16>}, {pipeline_mode = #tpu.pipeline_mode<synchronous>, transform_indices = @transform_1, window_bounds = array<i64: 16, 32>}, {pipeline_mode = #tpu.pipeline_mode<synchronous>, transform_indices = @transform_2, window_bounds = array<i64: 1, 32>}, {pipeline_mode = #tpu.pipeline_mode<synchronous>, transform_indices = @transform_3, window_bounds = array<i64: 32, 128>}, {pipeline_mode = #tpu.pipeline_mode<synchronous>, transform_indices = @transform_4, window_bounds = array<i64: 1, 128>}, {pipeline_mode = #tpu.pipeline_mode<synchronous>, transform_indices = @transform_5, window_bounds = array<i64: 128, 3>}, {pipeline_mode = #tpu.pipeline_mode<synchronous>, transform_indices = @transform_6, window_bounds = array<i64: 3, 128>}, {transform_indices = @transform_7, window_bounds = array<i64: 8, 128>}]} {
    %c0 = arith.constant 0 : index
    %c0_0 = arith.constant 0 : index
    %0 = vector.load %arg1[%c0, %c0_0] : memref<8x16xf32, #tpu.memory_space<vmem>>, vector<8x16xf32>
    %c0_1 = arith.constant 0 : index
    %c0_2 = arith.constant 0 : index
    %1 = vector.load %arg2[%c0_1, %c0_2] : memref<16x32xf32, #tpu.memory_space<vmem>>, vector<16x32xf32>
    %cst = arith.constant dense<0.000000e+00> : vector<8x32xf32>
    %2 = tpu.matmul %0, %1, %cst {dimension_numbers = #tpu.dot_dimension_numbers<[1], [0], [0], [1], [0, 0, 1, 1], [], []>} : vector<8x16xf32>, vector<16x32xf32>, vector<8x32xf32> -> vector<8x32xf32>
    %c0_3 = arith.constant 0 : index
    %c0_4 = arith.constant 0 : index
    %3 = vector.load %arg3[%c0_3, %c0_4] : memref<1x32xf32, #tpu.memory_space<vmem>>, vector<1x32xf32>
    %4 = vector.broadcast %3 : vector<1x32xf32> to vector<8x32xf32>
    %5 = arith.addf %2, %4 : vector<8x32xf32>
    %cst_5 = arith.constant 0.000000e+00 : f32
    %6 = vector.broadcast %cst_5 : f32 to vector<8x32xf32>
    %7 = arith.maximumf %5, %6 : vector<8x32xf32>
    %c0_6 = arith.constant 0 : index
    %c0_7 = arith.constant 0 : index
    %8 = vector.load %arg4[%c0_6, %c0_7] : memref<32x128xf32, #tpu.memory_space<vmem>>, vector<32x128xf32>
    %cst_8 = arith.constant dense<0.000000e+00> : vector<8x128xf32>
    %9 = tpu.matmul %7, %8, %cst_8 {dimension_numbers = #tpu.dot_dimension_numbers<[1], [0], [0], [1], [0, 0, 1, 1], [], []>} : vector<8x32xf32>, vector<32x128xf32>, vector<8x128xf32> -> vector<8x128xf32>
    %c0_9 = arith.constant 0 : index
    %c0_10 = arith.constant 0 : index
    %10 = vector.load %arg5[%c0_9, %c0_10] : memref<1x128xf32, #tpu.memory_space<vmem>>, vector<1x128xf32>
    %11 = vector.broadcast %10 : vector<1x128xf32> to vector<8x128xf32>
    %12 = arith.addf %9, %11 : vector<8x128xf32>
    %13 = vector.extract_strided_slice %12 {offsets = [0, 0], sizes = [8, 6], strides = [1, 1]} : vector<8x128xf32> to vector<8x6xf32>
    %cst_11 = arith.constant dense<0xFF800000> : vector<8xf32>
    %14 = vector.multi_reduction <maximumf>, %13, %cst_11 [1] : vector<8x6xf32> to vector<8xf32>
    %15 = vector.shape_cast %14 : vector<8xf32> to vector<8x1xf32>
    %16 = vector.extract_strided_slice %12 {offsets = [0, 6], sizes = [8, 10], strides = [1, 1]} : vector<8x128xf32> to vector<8x10xf32>
    %cst_12 = arith.constant dense<0xFF800000> : vector<8xf32>
    %17 = vector.multi_reduction <maximumf>, %16, %cst_12 [1] : vector<8x10xf32> to vector<8xf32>
    %18 = vector.shape_cast %17 : vector<8xf32> to vector<8x1xf32>
    %19 = vector.extract_strided_slice %12 {offsets = [0, 16], sizes = [8, 4], strides = [1, 1]} : vector<8x128xf32> to vector<8x4xf32>
    %cst_13 = arith.constant dense<0xFF800000> : vector<8xf32>
    %20 = vector.multi_reduction <maximumf>, %19, %cst_13 [1] : vector<8x4xf32> to vector<8xf32>
    %21 = vector.shape_cast %20 : vector<8xf32> to vector<8x1xf32>
    %22 = tpu.concatenate %15, %18, %21 in 1 : vector<8x1xf32>, vector<8x1xf32>, vector<8x1xf32> -> vector<8x3xf32>
    %c0_14 = arith.constant 0 : index
    %c0_15 = arith.constant 0 : index
    %23 = vector.load %arg7[%c0_14, %c0_15] : memref<3x128xf32, #tpu.memory_space<vmem>>, vector<3x128xf32>
    %cst_16 = arith.constant dense<0.000000e+00> : vector<8x128xf32>
    %24 = tpu.matmul %22, %23, %cst_16 {dimension_numbers = #tpu.dot_dimension_numbers<[1], [0], [0], [1], [0, 0, 1, 1], [], []>} : vector<8x3xf32>, vector<3x128xf32>, vector<8x128xf32> -> vector<8x128xf32>
    %25 = arith.subf %12, %24 : vector<8x128xf32>
    %26 = math.exp %25 : vector<8x128xf32>
    %c0_17 = arith.constant 0 : index
    %c0_18 = arith.constant 0 : index
    %27 = vector.load %arg6[%c0_17, %c0_18] : memref<128x3xf32, #tpu.memory_space<vmem>>, vector<128x3xf32>
    %cst_19 = arith.constant dense<0.000000e+00> : vector<8x3xf32>
    %28 = tpu.matmul %26, %27, %cst_19 {dimension_numbers = #tpu.dot_dimension_numbers<[1], [0], [0], [1], [0, 0, 1, 1], [], []>} : vector<8x128xf32>, vector<128x3xf32>, vector<8x3xf32> -> vector<8x3xf32>
    %29 = math.log %28 : vector<8x3xf32>
    %30 = arith.addf %22, %29 : vector<8x3xf32>
    %c0_20 = arith.constant 0 : index
    %c0_21 = arith.constant 0 : index
    %31 = vector.load %arg7[%c0_20, %c0_21] : memref<3x128xf32, #tpu.memory_space<vmem>>, vector<3x128xf32>
    %cst_22 = arith.constant dense<0.000000e+00> : vector<8x128xf32>
    %32 = tpu.matmul %30, %31, %cst_22 {dimension_numbers = #tpu.dot_dimension_numbers<[1], [0], [0], [1], [0, 0, 1, 1], [], []>} : vector<8x3xf32>, vector<3x128xf32>, vector<8x128xf32> -> vector<8x128xf32>
    %33 = arith.subf %12, %32 : vector<8x128xf32>
    %c0_23 = arith.constant 0 : index
    %c0_24 = arith.constant 0 : index
    %34 = vector.load %arg8[%c0_23, %c0_24] : memref<8x128xf32, #tpu.memory_space<vmem>>, vector<8x128xf32>
    tpu.vector_store %arg8[%c0_23, %c0_24], %33 {strides = array<i32>} : memref<8x128xf32, #tpu.memory_space<vmem>>, vector<8x128xf32>,
    return
  }
  func.func @transform_0(%arg0: i32) -> (i32, i32) {
    %c0_i32 = arith.constant 0 : i32
    %c0_i32_0 = arith.constant 0 : i32
    return %arg0, %c0_i32 : i32, i32
  }
  func.func @transform_1(%arg0: i32) -> (i32, i32) {
    %c0_i32 = arith.constant 0 : i32
    %c0_i32_0 = arith.constant 0 : i32
    %c0_i32_1 = arith.constant 0 : i32
    return %c0_i32, %c0_i32_0 : i32, i32
  }
  func.func @transform_2(%arg0: i32) -> (i32, i32) {
    %c0_i32 = arith.constant 0 : i32
    %c0_i32_0 = arith.constant 0 : i32
    %c0_i32_1 = arith.constant 0 : i32
    return %c0_i32, %c0_i32_0 : i32, i32
  }
  func.func @transform_3(%arg0: i32) -> (i32, i32) {
    %c0_i32 = arith.constant 0 : i32
    %c0_i32_0 = arith.constant 0 : i32
    %c0_i32_1 = arith.constant 0 : i32
    return %c0_i32, %c0_i32_0 : i32, i32
  }
  func.func @transform_4(%arg0: i32) -> (i32, i32) {
    %c0_i32 = arith.constant 0 : i32
    %c0_i32_0 = arith.constant 0 : i32
    %c0_i32_1 = arith.constant 0 : i32
    return %c0_i32, %c0_i32_0 : i32, i32
  }
  func.func @transform_5(%arg0: i32) -> (i32, i32) {
    %c0_i32 = arith.constant 0 : i32
    %c0_i32_0 = arith.constant 0 : i32
    %c0_i32_1 = arith.constant 0 : i32
    return %c0_i32, %c0_i32_0 : i32, i32
  }
  func.func @transform_6(%arg0: i32) -> (i32, i32) {
    %c0_i32 = arith.constant 0 : i32
    %c0_i32_0 = arith.constant 0 : i32
    %c0_i32_1 = arith.constant 0 : i32
    return %c0_i32, %c0_i32_0 : i32, i32
  }
  func.func @transform_7(%arg0: i32) -> (i32, i32) {
    %c0_i32 = arith.constant 0 : i32
    %c0_i32_0 = arith.constant 0 : i32
    return %arg0, %c0_i32 : i32, i32
  }
}

</mosaic_0001>

<bundles_post_ra>
// kernel: tpu_custom_call.1
= control target key start
LH: loop header
LB: loop body
LE: loop exit
PB: predicated region body
PF: predicated region fallthrough
CT: control target
= control target key end

     0   :  { %v638_v2 = vmov 0.0|0.0   ;;  %vm639_vm0 = vmmov 0   ;;  %v640_v4 = vmov 0.0   ;;  %s806_s0 = inlined_call_operand.vmem [shape: f32[8,16], index: 0, kind: input, shape index: {}]   ;;  %s807_s1 = inlined_call_operand.vmem [shape: f32[16,32], index: 1, kind: input, shape index: {}]   ;;  %s808_s2 = inlined_call_operand.vmem [shape: f32[1,32], index: 2, kind: input, shape index: {}]   ;;  %s809_s3 = inlined_call_operand.vmem [shape: f32[32,128], index: 3, kind: input, shape index: {}]   ;;  %s810_s4 = inlined_call_operand.vmem [shape: f32[1,128], index: 4, kind: input, shape index: {}]   ;;  %s811_s5 = inlined_call_operand.vmem [shape: f32[128,3], index: 5, kind: input, shape index: {}]   ;;  %s812_s6 = inlined_call_operand.vmem [shape: f32[3,128], index: 6, kind: input, shape index: {}]   ;;  %s813_s7 = inlined_call_operand.hbm [shape: f32[8,128], index: 7, kind: output, shape index: {}]  }
   0x1   :  { %v28_v0 = vld [vmem:[%s807_s1] sm:$0xff]  ;;  %v29_v1 = vld [vmem:[%s807_s1 + $0x8] sm:$0xff]  ;;  %573 = vmatprep.subr.bf16.mxu1 %v638_v2  ;;  %514 = vmatprep.mubr.msk.f32.mxu1 %vm639_vm0, %v640_v4 }
   0x2   :  { %v574_v3 = vpack.c.bf16 %v29_v1, %v28_v0  ;;  %v112_v5 = vld [vmem:[%s809_s3] sm:$0xff]  ;;  %v113_v6 = vld [vmem:[%s809_s3 + $0x8] sm:$0xff]  ;;  %582 = vmatprep.subr.bf16.mxu0 %v638_v2  ;;  %565 = vmatprep.mubr.msk.f32.mxu0 %vm639_vm0, %v640_v4 }
   0x3   :  { %12 = vsyncpa [#allocation3], 0  ;;  %v27_v7 = vld [vmem:[%s806_s0] sm:$0xff]  ;;  %vm37_vm1 = vcmask 130048   ;;  %v577_v8 = vpack.c.bf16 %v113_v6, %v112_v5  ;;  %v114_v9 = vld [vmem:[%s809_s3 + $0x10] sm:$0xff]  ;;  %vm123_vm2 = vcmask 261120  }
   0x4   :  { %575 = vmatpush3.bf16.msra.mxu1 %v574_v3  ;;  %v115_v10 = vld [vmem:[%s809_s3 + $0x18] sm:$0xff]  ;;  %v473_v12 = vld [vmem:[%s808_s2] ss:$0 sm:$0xff]  ;;  %vm205_vm3 = vcmask 162944   ;;  %vm197_vm4 = vcmask 48128   ;;  %vm201_vm5 = vcmask 130096  }
   0x5   :  { %576 = vmatprep.subr.bf16.mxu1 %v638_v2  ;;  %v580_v11 = vpack.c.bf16 %v115_v10, %v114_v9  ;;  %v475_v17 = vld [vmem:[%s810_s4] ss:$0 sm:$0xff]  ;;  %vm218_vm6 = vcmask 1042432   ;;  %v296_v26 = vld [vmem:[%s811_s5 + $0x8] sm:$0xff]  ;;  %v297_v27 = vld [vmem:[%s811_s5 + $0x10] sm:$0xff]  ;;  %vm209_vm7 = vcmask 7168  }
   0x6   :  { %v213_v24 = vld [vmem:[%s812_s6] sm:$0x7]  ;;  %v298_v29 = vld [vmem:[%s811_s5 + $0x18] sm:$0xff]  ;;  %v300_v32 = vld [vmem:[%s811_s5 + $0x28] sm:$0xff]  ;;  %vm211_vm8 = vcmask 15360   ;;  %vm214_vm9 = vcmask 23552  }
   0x7   :  { %515 = vmatmul.mubr.msk.f32.vlgmr.msra.gmra.mrb[0].mxu1 %vm37_vm1, %v27_v7  ;;  %v295_v25 = vld [vmem:[%s811_s5] sm:$0xff]  ;;  %v586_v30 = vpack.c.bf16 %v298_v29, %v297_v27  ;;  %v301_v34 = vld [vmem:[%s811_s5 + $0x30] sm:$0xff]  ;;  %v302_v35 = vld [vmem:[%s811_s5 + $0x38] sm:$0xff] }
   0x8   :  { %578 = vmatpush3.bf16.msra.mxu1 %v577_v8  ;;  %525 = vmatprep.mubr.msk.f32.mxu1 %vm639_vm0, %v640_v4  ;;  %v583_v28 = vpack.c.bf16 %v296_v26, %v295_v25  ;;  %v299_v31 = vld [vmem:[%s811_s5 + $0x20] sm:$0xff]  ;;  %v592_v36 = vpack.c.bf16 %v302_v35, %v301_v34  ;;  %v304_v43 = vld [vmem:[%s811_s5 + $0x48] sm:$0xff]  ;;  %v305_v45 = vld [vmem:[%s811_s5 + $0x50] sm:$0xff] }
   0x9   :  { %579 = vmatprep.subr.bf16.mxu1 %v638_v2  ;;  %v589_v33 = vpack.c.bf16 %v300_v32, %v299_v31  ;;  %v303_v42 = vld [vmem:[%s811_s5 + $0x40] sm:$0xff]  ;;  %v306_v46 = vld [vmem:[%s811_s5 + $0x58] sm:$0xff]  ;;  %v308_v49 = vld [vmem:[%s811_s5 + $0x68] sm:$0xff] }
   0xa   :  { %584 = vmatpush3.bf16.msra.mxu0 %v583_v28  ;;  %v595_v44 = vpack.c.bf16 %v304_v43, %v303_v42  ;;  %v598_v47 = vpack.c.bf16 %v306_v46, %v305_v45  ;;  %v307_v48 = vld [vmem:[%s811_s5 + $0x60] sm:$0xff]  ;;  %v309_v51 = vld [vmem:[%s811_s5 + $0x70] sm:$0xff]  ;;  %v310_v52 = vld [vmem:[%s811_s5 + $0x78] sm:$0xff]  ;;  %s641_s5 = smov [#allocation2]  }
   0xb   :  { %585 = vmatprep.subr.bf16.mxu0 %v638_v2  ;;  %v601_v50 = vpack.c.bf16 %v308_v49, %v307_v48  ;;  %v604_v53 = vpack.c.bf16 %v310_v52, %v309_v51  ;;  %s465_s19 = sshll.u32 %s641_s5, 4  ;;  %s466_s19 = int_to_ptr.vmem [resolvable:$true] %s465_s19 }
   0xc   :  { %581 = vmatpush3.bf16.msra.mxu1 %v580_v11  ;;  %s614_s20 = scalar_lea.vmem %s466_s19, 128  ;;  %p619_p1 = scmp.lt.s32.totalorder %s466_s19, %s466_s19 }
   0xd   :  { %528 = vmatprep.subr.mxu1 %v640_v4  ;;  %p615_p0 = scmp.ne.s32.totalorder %s466_s19, %s614_s20  ;;  %p620_p2 = scmp.lt.s32.totalorder %s614_s20, %s614_s20 }
   0xe   :  { %587 = vmatpush3.bf16.msra.mxu0 %v586_v30 }
   0xf   :  { %588 = vmatprep.subr.bf16.mxu0 %v638_v2  ;;  %p621_p3 = por %p620_p2, %p619_p1 }
  0x11   :  { %p622_p4 = pnand %p621_p3, %p615_p0 }
  0x12   :  { %590 = vmatpush3.bf16.msra.mxu0 %v589_v33 }
  0x13   :  { %591 = vmatprep.subr.bf16.mxu0 %v638_v2 }
  0x16   :  { %593 = vmatpush3.bf16.msra.mxu0 %v592_v36 }
  0x17   :  { %594 = vmatprep.subr.bf16.mxu0 %v638_v2 }
  0x1a   :  { %596 = vmatpush3.bf16.msra.mxu0 %v595_v44 }
  0x1b   :  { %597 = vmatprep.subr.bf16.mxu0 %v638_v2 }
  0x1e   :  { %599 = vmatpush3.bf16.msra.mxu0 %v598_v47 }
  0x1f   :  { %600 = vmatprep.subr.bf16.mxu0 %v638_v2 }
  0x22   :  { %602 = vmatpush3.bf16.msra.mxu0 %v601_v50 }
  0x23   :  { %603 = vmatprep.subr.bf16.mxu0 %v638_v2 }
  0x26   :  { %605 = vmatpush3.bf16.msra.mxu0 %v604_v53 }
  0xda   :  { %v107_v13 = vpop.f32.mrb[0].mxu1 }
  0xdb   :  { %v108_v14 = vadd.f32 %v473_v12, %v107_v13  ;;  %v516_v15 = vpop.f32.mrb[1].mxu1 }
  0xdd   :  { %v111_v16 = vmax.f32 %v108_v14, 0.0 }
  0xdf   :  { %526 = vmatmul.mubr.msk.f32.vlgmr.msra.gmra.mrb[2].mxu1 %vm123_vm2, %v111_v16 }
  0xe0   :  { %530 = vmatprep.mubr.msk.f32.mxu1 %vm639_vm0, %v640_v4  ;;  %529 = vmatpush3.msk.msra.mxu1 %vm218_vm6, %v213_v24 }
  0xe1   :  { %568 = vmatprep.subr.mxu1 %v640_v4 }
 0x1b2   :  { %v193_v18 = vpop.f32.mrb[2].mxu1 }
 0x1b3   :  { %v722_v19 = vadd.f32 %v475_v17, %v193_v18  ;;  %v527_v20 = vpop.f32.mrb[3].mxu1 }
 0x1b5   :  { %v206_v21 = vsel %vm205_vm3, %v722_v19, -inf  ;;  %v198_v22 = vsel %vm197_vm4, %v722_v19, -inf  ;;  %v202_v23 = vsel %vm201_vm5, %v722_v19, -inf }
 0x1b6   :  { %207 = vmax.xlane.f32.xlu1 %v206_v21  ;;  %199 = vmax.xlane.f32.xlu0 %v198_v22 }
 0x1ba   :  { %203 = vmax.xlane.f32.xlu0 %v202_v23 }
 0x243   :  { %v200_v37 = vpop.xlane.xlu0 %199  ;;  %v208_v39 = vpop.xlane.xlu1 %207 }
 0x247   :  { %v204_v38 = vpop.xlane.xlu0 %203 }
 0x248   :  { %v210_v40 = vsel %vm209_vm7, %v200_v37, %v204_v38 }
 0x249   :  { %v212_v41 = vsel %vm211_vm8, %v210_v40, %v208_v39 }
 0x24a   :  { %531 = vmatmul.mubr.msk.f32.vlgmr.msra.gmra.mrb[4].mxu1 %vm214_vm9, %v212_v41 }
 0x24b   :  { %569 = vmatpush3.msk.msra.mxu1 %vm218_vm6, %v213_v24  ;;  %570 = vmatprep.mubr.msk.f32.mxu1 %vm639_vm0, %v640_v4 }
 0x31d   :  { %v288_v54 = vpop.f32.mrb[4].mxu1 }
 0x31e   :  { %v292_v55 = vsub.f32 %v722_v19, %v288_v54  ;;  %v532_v56 = vpop.f32.mrb[5].mxu1 }
 0x320   :  { %v293_v57 = vmul.f32 1.442695, %v292_v55 }
 0x322   :  { %610 = vpow2.f32 %v293_v57 }
 0x32c   :  { %v611_v58 = vpop.eup %610 }
 0x32d   :  { %566 = vmatmul.mubr.f32.vlgmr.msra.gmra.mrb[0].mxu0 %v611_v58 }
 0x400   :  { %v377_v59 = vpop.f32.mrb[0].mxu0 }
 0x401   :  { %612 = vlog2.f32 %v377_v59  ;;  %v567_v60 = vpop.f32.mrb[1].mxu0 }
 0x40b   :  { %v613_v61 = vpop.eup %612 }
 0x40c   :  { %v382_v62 = vmul.f32 0.6931472, %v613_v61 }
 0x40e   :  { %v383_v63 = vadd.f32 %v382_v62, %v212_v41 }
 0x410   :  { %571 = vmatmul.mubr.msk.f32.vlgmr.msra.gmra.mrb[6].mxu1 %vm214_vm9, %v383_v63 }
 0x4e3   :  { %v453_v0 = vpop.f32.mrb[6].mxu1 }
 0x4e4   :  { %v457_v1 = vsub.f32 %v722_v19, %v453_v0  ;;  %v572_v2 = vpop.f32.mrb[7].mxu1 }
 0x4e6   :  { %458 = vst [vmem:[#allocation2] sm:$0xff] %v457_v1 }
 0x4e7   :  { %625 = shalt.err (!%p622_p4)
}
 0x4e8   :  { %s626_s6 = scalar_lea.hbm %s813_s7, 128 }
 0x4e9   :  { %p627_p5 = scmp.ne.s32.totalorder %s813_s7, %s626_s6  ;;  %p630_p6 = scmp.lt.u32.totalorder %s626_s6, %s813_s7 }
 0x4eb   :  { %p632_p7 = pnand %p630_p6, %p627_p5 }
 0x4ed   :  { %635 = shalt.err (!%p632_p7)
}
 0x4ee   :  { %468 = dma.vmem_to_hbm [thread:$0]  %s466_s19, 128, %s813_s7, [#allocation3]  }
 0x4ef   :  { %636 = dma.done.wait [#allocation3], 128  }
 0x4f0   :  { %637 = vsyncadd [#allocation3], 4294967168 }
 0x4f1   :  { %472 = vsyncpa [#allocation3], 1 }

</bundles_post_ra>
